<compile_context>
chip_gen: v7x
topology: tpu7x:2x2x1
jax: 0.10.0
libtpu: 0.0.40
codegen_flags: <defaults>
</compile_context>

<pallas_src>
import numpy as np
import jax
import jax.numpy as jnp
from jax.experimental import pallas as pl
from jax.experimental.pallas import tpu as pltpu


def _round_up(x, m):
    return ((x + m - 1) // m) * m


def _loss_fft_kernel(img_ref, gt_ref, dft_ref, out_ref, acc_ref):
    k = pl.program_id(1)

    @pl.when(k == 0)
    def _():
        acc_ref[...] = jnp.zeros_like(acc_ref)

    # f32 diff for accuracy, bf16 operands for the fast MXU path, f32 accum.
    x = (img_ref[...] - gt_ref[...]).astype(jnp.bfloat16)
    acc_ref[...] += jnp.dot(x, dft_ref[...], preferred_element_type=jnp.float32)

    @pl.when(k == pl.num_programs(1) - 1)
    def _():
        # Per-step partial sums, reduced only over the batch axis (lane-dense).
        out_ref[...] = jnp.sum(jnp.abs(acc_ref[...]), axis=0)[None, None, :]


def _dft_matrix(H, W, nf_pad):
    """(H*W, nf_pad) bf16 matrix producing [Re | Im] of the 2-D rFFT.

    X[k1, k2] = sum_{h,w} x[h, w] * exp(-2*pi*i*(h*k1/H + w*k2/W)),
    k2 in [0, W//2], matching torch.fft.rfftn(dim=(2, 3)) / jnp.fft.rfftn.
    Columns beyond 2*H*Wf are zero (lane padding), adding nothing to sum|.|.
    """
    Wf = W // 2 + 1
    ph = np.outer(np.arange(H), np.arange(H)) / float(H)      # (h, k1)
    pw = np.outer(np.arange(W), np.arange(Wf)) / float(W)     # (w, k2)
    theta = 2.0 * np.pi * (ph[:, None, :, None] + pw[None, :, None, :])
    re = np.cos(theta).reshape(H * W, H * Wf)
    im = (-np.sin(theta)).reshape(H * W, H * Wf)
    d = np.zeros((H * W, nf_pad), dtype=np.float32)
    d[:, : H * Wf] = re
    d[:, H * Wf : 2 * H * Wf] = im
    return jnp.asarray(d).astype(jnp.bfloat16)


_VMEM_BUDGET = 28 << 20       # per-pipeline budget, safe on every generation
_DFT_TILE_BUDGET = 8 << 20    # max bytes for one (TK, NF) bf16 DFT tile


def _pick_tk(HW, NF):
    """K-tile over H*W: full HW if the DFT tile fits, else a mult-of-128 divisor."""
    if HW * NF * 2 <= _DFT_TILE_BUDGET or HW % 128 != 0:
        return HW
    best = 128
    d = 128
    while d < HW:
        if HW % d == 0 and d * NF * 2 <= _DFT_TILE_BUDGET:
            best = d
        d += 128
    return best


def _pick_tb(B, TK, NF, dft_bufs, max_block=1024, target_steps=8):
    """Images per grid step: aim for >= target_steps steps, stay in VMEM budget."""
    fixed = dft_bufs * TK * NF * 2 + 2 * NF * 4
    per_row = (2 * 2 * TK * 4        # imgs + gts, double-buffered, f32
               + TK * 4 + TK * 2     # diff temp (f32 + bf16)
               + NF * 4              # accumulator scratch (f32)
               + NF * 4)             # matmul result temp (f32)
    cap = max(8, ((_VMEM_BUDGET - fixed) // per_row) // 8 * 8)
    tb = _round_up(max(1, -(-B // target_steps)), 8)
    return max(8, min(tb, max_block, cap))


def loss_fft(imgs, gts, *, max_block=1024):
    """Pallas implementation of LossFFT.forward for NCHW float inputs."""
    N, C, H, W = imgs.shape
    assert gts.shape == imgs.shape
    Wf = W // 2 + 1
    B = N * C
    HW = H * W
    NF = _round_up(2 * H * Wf, 128)       # lane-dense output width

    imgs_f = imgs.reshape(B, HW).astype(jnp.float32)
    gts_f = gts.reshape(B, HW).astype(jnp.float32)

    TK = _pick_tk(HW, NF)
    KG = HW // TK
    dft_bufs = 1 if KG == 1 else 2
    TB = _pick_tb(B, TK, NF, dft_bufs, max_block=max_block)

    Bp = _round_up(B, TB)
    if Bp != B:
        pad = Bp - B
        # Zero rows have zero FFT -> contribute exactly 0 to the summed |.|.
        imgs_f = jnp.pad(imgs_f, ((0, pad), (0, 0)))
        gts_f = jnp.pad(gts_f, ((0, pad), (0, 0)))
    G = Bp // TB

    dft = _dft_matrix(H, W, NF)

    est_vmem = (2 * 2 * TB * TK * 4 + dft_bufs * TK * NF * 2 + 2 * NF * 4
                + TB * NF * 4 + TB * TK * 6 + TB * NF * 4)
    vmem_limit = int(min(60 << 20, max(32 << 20, est_vmem * 3 // 2)))

    cost = pl.CostEstimate(
        flops=2 * Bp * HW * NF,
        transcendentals=0,
        bytes_accessed=2 * Bp * HW * 4 + HW * NF * 2 + G * NF * 4,
    )

    def build(single_buffer_dft):
        if single_buffer_dft:
            dft_spec = pl.BlockSpec((TK, NF), lambda i, k: (k, 0),
                                    pipeline_mode=pl.Buffered(1))
        else:
            dft_spec = pl.BlockSpec((TK, NF), lambda i, k: (k, 0))
        return pl.pallas_call(
            _loss_fft_kernel,
            out_shape=jax.ShapeDtypeStruct((G, 1, NF), jnp.float32),
            grid_spec=pltpu.PrefetchScalarGridSpec(
                num_scalar_prefetch=0,
                grid=(G, KG),
                in_specs=[
                    pl.BlockSpec((TB, TK), lambda i, k: (i, k)),   # imgs block
                    pl.BlockSpec((TB, TK), lambda i, k: (i, k)),   # gts block
                    dft_spec,                                      # DFT (const/K-tiled)
                ],
                out_specs=pl.BlockSpec((1, 1, NF), lambda i, k: (i, 0, 0)),
                scratch_shapes=[pltpu.VMEM((TB, NF), jnp.float32)],
            ),
            compiler_params=pltpu.CompilerParams(
                dimension_semantics=("parallel", "arbitrary"),
                vmem_limit_bytes=vmem_limit),
            cost_estimate=cost,
        )

    try:
        partials = build(dft_bufs == 1)(imgs_f, gts_f, dft)
    except Exception:
        # Fallback if pl.Buffered(1) is rejected by this jax/Mosaic version.
        partials = build(False)(imgs_f, gts_f, dft)

    # Denominator of the L1 mean over concat[Re, Im]: N * (2*C) * H * Wf.
    total_count = float(N * 2 * C * H * Wf)
    return jnp.sum(partials) / total_count


def _reference_loss_fft(imgs, gts):
    """Pure-JAX reference mirroring the PyTorch module."""
    fi = jnp.fft.rfftn(imgs, axes=(2, 3))
    fg = jnp.fft.rfftn(gts, axes=(2, 3))
    i_cat = jnp.concatenate([fi.real, fi.imag], axis=1)
    g_cat = jnp.concatenate([fg.real, fg.imag], axis=1)
    return jnp.mean(jnp.abs(i_cat - g_cat))


if __name__ == "__main__":
    key = jax.random.PRNGKey(0)
    k1, k2 = jax.random.split(key)
    N, C, H, W = 2, 4, 16, 16
    imgs = jax.random.normal(k1, (N, C, H, W), dtype=jnp.float32)
    gts = jax.random.normal(k2, (N, C, H, W), dtype=jnp.float32)

    loss = jax.block_until_ready(loss_fft(imgs, gts))
    ref = jax.block_until_ready(_reference_loss_fft(imgs, gts))

    if not np.allclose(np.asarray(loss), np.asarray(ref), rtol=1e-3, atol=1e-3):
        raise AssertionError(f"mismatch: pallas={loss} ref={ref}")
    print("KERNEL_OK")
</pallas_src>

<mosaic_0001>
module attributes {stable_mosaic.version = 11 : i64} {
  func.func @_loss_fft_kernel(%arg0: i32, %arg1: i32, %arg2: memref<8x256xf32, #tpu.memory_space<vmem>>, %arg3: memref<8x256xf32, #tpu.memory_space<vmem>>, %arg4: memref<256x384xbf16, #tpu.memory_space<vmem>>, %arg5: memref<1x1x384xf32, #tpu.memory_space<vmem>>, %arg6: memref<8x384xf32, #tpu.memory_space<vmem>>) attributes {dimension_semantics = [#tpu.dimension_semantics<parallel>, #tpu.dimension_semantics<arbitrary>], iteration_bounds = array<i64: 1, 1>, scalar_prefetch = 0 : i64, scratch_operands = 1 : i64, tpu.core_type = #tpu.core_type<tc>, window_params = [{transform_indices = @transform_0, window_bounds = array<i64: 8, 256>}, {transform_indices = @transform_1, window_bounds = array<i64: 8, 256>}, {pipeline_mode = #tpu.pipeline_mode<synchronous>, transform_indices = @transform_2, window_bounds = array<i64: 256, 384>}, {transform_indices = @transform_3, window_bounds = array<i64: 1, 1, 384>}]} {
    %c0_i32 = arith.constant 0 : i32
    %0 = arith.cmpi eq, %arg1, %c0_i32 : i32
    %1 = arith.extui %0 : i1 to i32
    %c0_i32_0 = arith.constant 0 : i32
    %2 = arith.cmpi ne, %1, %c0_i32_0 : i32
    scf.if %2 {
      %cst_12 = arith.constant 0.000000e+00 : f32
      %15 = vector.broadcast %cst_12 : f32 to vector<8x384xf32>
      %c0_13 = arith.constant 0 : index
      %c0_14 = arith.constant 0 : index
      %16 = vector.load %arg6[%c0_13, %c0_14] : memref<8x384xf32, #tpu.memory_space<vmem>>, vector<8x384xf32>
      tpu.vector_store %arg6[%c0_13, %c0_14], %15 {strides = array<i32>} : memref<8x384xf32, #tpu.memory_space<vmem>>, vector<8x384xf32>,
    } else {
    }
    %c0 = arith.constant 0 : index
    %c0_1 = arith.constant 0 : index
    %3 = vector.load %arg2[%c0, %c0_1] : memref<8x256xf32, #tpu.memory_space<vmem>>, vector<8x256xf32>
    %c0_2 = arith.constant 0 : index
    %c0_3 = arith.constant 0 : index
    %4 = vector.load %arg3[%c0_2, %c0_3] : memref<8x256xf32, #tpu.memory_space<vmem>>, vector<8x256xf32>
    %5 = arith.subf %3, %4 : vector<8x256xf32>
    %6 = arith.truncf %5 : vector<8x256xf32> to vector<8x256xbf16>
    %c0_4 = arith.constant 0 : index
    %c0_5 = arith.constant 0 : index
    %7 = vector.load %arg6[%c0_4, %c0_5] : memref<8x384xf32, #tpu.memory_space<vmem>>, vector<8x384xf32>
    %c0_6 = arith.constant 0 : index
    %c0_7 = arith.constant 0 : index
    %8 = vector.load %arg4[%c0_6, %c0_7] : memref<256x384xbf16, #tpu.memory_space<vmem>>, vector<256x384xbf16>
    %cst = arith.constant dense<0.000000e+00> : vector<8x384xf32>
    %9 = tpu.matmul %6, %8, %cst {dimension_numbers = #tpu.dot_dimension_numbers<[1], [0], [0], [1], [0, 0, 1, 1], [], []>} : vector<8x256xbf16>, vector<256x384xbf16>, vector<8x384xf32> -> vector<8x384xf32>
    %10 = arith.addf %7, %9 : vector<8x384xf32>
    %c0_8 = arith.constant 0 : index
    %c0_9 = arith.constant 0 : index
    %11 = vector.load %arg6[%c0_8, %c0_9] : memref<8x384xf32, #tpu.memory_space<vmem>>, vector<8x384xf32>
    tpu.vector_store %arg6[%c0_8, %c0_9], %10 {strides = array<i32>} : memref<8x384xf32, #tpu.memory_space<vmem>>, vector<8x384xf32>,
    %c0_i32_10 = arith.constant 0 : i32
    %12 = arith.cmpi eq, %arg1, %c0_i32_10 : i32
    %13 = arith.extui %12 : i1 to i32
    %c0_i32_11 = arith.constant 0 : i32
    %14 = arith.cmpi ne, %13, %c0_i32_11 : i32
    scf.if %14 {
      %c0_12 = arith.constant 0 : index
      %c0_13 = arith.constant 0 : index
      %15 = vector.load %arg6[%c0_12, %c0_13] : memref<8x384xf32, #tpu.memory_space<vmem>>, vector<8x384xf32>
      %16 = math.absf %15 : vector<8x384xf32>
      %cst_14 = arith.constant dense<0.000000e+00> : vector<384xf32>
      %17 = vector.multi_reduction <add>, %16, %cst_14 [0] : vector<8x384xf32> to vector<384xf32>
      %18 = vector.shape_cast %17 : vector<384xf32> to vector<1x1x384xf32>
      %c0_15 = arith.constant 0 : index
      %c0_16 = arith.constant 0 : index
      %c0_17 = arith.constant 0 : index
      %19 = vector.load %arg5[%c0_15, %c0_16, %c0_17] : memref<1x1x384xf32, #tpu.memory_space<vmem>>, vector<1x1x384xf32>
      tpu.vector_store %arg5[%c0_15, %c0_16, %c0_17], %18 {strides = array<i32>} : memref<1x1x384xf32, #tpu.memory_space<vmem>>, vector<1x1x384xf32>,
    } else {
    }
    return
  }
  func.func @transform_0(%arg0: i32, %arg1: i32) -> (i32, i32) {
    %c0_i32 = arith.constant 0 : i32
    return %arg0, %arg1 : i32, i32
  }
  func.func @transform_1(%arg0: i32, %arg1: i32) -> (i32, i32) {
    %c0_i32 = arith.constant 0 : i32
    return %arg0, %arg1 : i32, i32
  }
  func.func @transform_2(%arg0: i32, %arg1: i32) -> (i32, i32) {
    %c0_i32 = arith.constant 0 : i32
    %c0_i32_0 = arith.constant 0 : i32
    return %arg1, %c0_i32 : i32, i32
  }
  func.func @transform_3(%arg0: i32, %arg1: i32) -> (i32, i32, i32) {
    %c0_i32 = arith.constant 0 : i32
    %c0_i32_0 = arith.constant 0 : i32
    %c0_i32_1 = arith.constant 0 : i32
    return %arg0, %c0_i32, %c0_i32_0 : i32, i32, i32
  }
}

module attributes {stable_mosaic.version = 11 : i64} {
  func.func @_loss_fft_kernel(%arg0: i32, %arg1: i32, %arg2: memref<8x256xf32, #tpu.memory_space<vmem>>, %arg3: memref<8x256xf32, #tpu.memory_space<vmem>>, %arg4: memref<256x384xbf16, #tpu.memory_space<vmem>>, %arg5: memref<1x1x384xf32, #tpu.memory_space<vmem>>, %arg6: memref<8x384xf32, #tpu.memory_space<vmem>>) attributes {dimension_semantics = [#tpu.dimension_semantics<parallel>, #tpu.dimension_semantics<arbitrary>], iteration_bounds = array<i64: 1, 1>, scalar_prefetch = 0 : i64, scratch_operands = 1 : i64, tpu.core_type = #tpu.core_type<tc>, window_params = [{transform_indices = @transform_0, window_bounds = array<i64: 8, 256>}, {transform_indices = @transform_1, window_bounds = array<i64: 8, 256>}, {transform_indices = @transform_2, window_bounds = array<i64: 256, 384>}, {transform_indices = @transform_3, window_bounds = array<i64: 1, 1, 384>}]} {
    %c0_i32 = arith.constant 0 : i32
    %0 = arith.cmpi eq, %arg1, %c0_i32 : i32
    %1 = arith.extui %0 : i1 to i32
    %c0_i32_0 = arith.constant 0 : i32
    %2 = arith.cmpi ne, %1, %c0_i32_0 : i32
    scf.if %2 {
      %cst_12 = arith.constant 0.000000e+00 : f32
      %15 = vector.broadcast %cst_12 : f32 to vector<8x384xf32>
      %c0_13 = arith.constant 0 : index
      %c0_14 = arith.constant 0 : index
      %16 = vector.load %arg6[%c0_13, %c0_14] : memref<8x384xf32, #tpu.memory_space<vmem>>, vector<8x384xf32>
      tpu.vector_store %arg6[%c0_13, %c0_14], %15 {strides = array<i32>} : memref<8x384xf32, #tpu.memory_space<vmem>>, vector<8x384xf32>,
    } else {
    }
    %c0 = arith.constant 0 : index
    %c0_1 = arith.constant 0 : index
    %3 = vector.load %arg2[%c0, %c0_1] : memref<8x256xf32, #tpu.memory_space<vmem>>, vector<8x256xf32>
    %c0_2 = arith.constant 0 : index
    %c0_3 = arith.constant 0 : index
    %4 = vector.load %arg3[%c0_2, %c0_3] : memref<8x256xf32, #tpu.memory_space<vmem>>, vector<8x256xf32>
    %5 = arith.subf %3, %4 : vector<8x256xf32>
    %6 = arith.truncf %5 : vector<8x256xf32> to vector<8x256xbf16>
    %c0_4 = arith.constant 0 : index
    %c0_5 = arith.constant 0 : index
    %7 = vector.load %arg6[%c0_4, %c0_5] : memref<8x384xf32, #tpu.memory_space<vmem>>, vector<8x384xf32>
    %c0_6 = arith.constant 0 : index
    %c0_7 = arith.constant 0 : index
    %8 = vector.load %arg4[%c0_6, %c0_7] : memref<256x384xbf16, #tpu.memory_space<vmem>>, vector<256x384xbf16>
    %cst = arith.constant dense<0.000000e+00> : vector<8x384xf32>
    %9 = tpu.matmul %6, %8, %cst {dimension_numbers = #tpu.dot_dimension_numbers<[1], [0], [0], [1], [0, 0, 1, 1], [], []>} : vector<8x256xbf16>, vector<256x384xbf16>, vector<8x384xf32> -> vector<8x384xf32>
    %10 = arith.addf %7, %9 : vector<8x384xf32>
    %c0_8 = arith.constant 0 : index
    %c0_9 = arith.constant 0 : index
    %11 = vector.load %arg6[%c0_8, %c0_9] : memref<8x384xf32, #tpu.memory_space<vmem>>, vector<8x384xf32>
    tpu.vector_store %arg6[%c0_8, %c0_9], %10 {strides = array<i32>} : memref<8x384xf32, #tpu.memory_space<vmem>>, vector<8x384xf32>,
    %c0_i32_10 = arith.constant 0 : i32
    %12 = arith.cmpi eq, %arg1, %c0_i32_10 : i32
    %13 = arith.extui %12 : i1 to i32
    %c0_i32_11 = arith.constant 0 : i32
    %14 = arith.cmpi ne, %13, %c0_i32_11 : i32
    scf.if %14 {
      %c0_12 = arith.constant 0 : index
      %c0_13 = arith.constant 0 : index
      %15 = vector.load %arg6[%c0_12, %c0_13] : memref<8x384xf32, #tpu.memory_space<vmem>>, vector<8x384xf32>
      %16 = math.absf %15 : vector<8x384xf32>
      %cst_14 = arith.constant dense<0.000000e+00> : vector<384xf32>
      %17 = vector.multi_reduction <add>, %16, %cst_14 [0] : vector<8x384xf32> to vector<384xf32>
      %18 = vector.shape_cast %17 : vector<384xf32> to vector<1x1x384xf32>
      %c0_15 = arith.constant 0 : index
      %c0_16 = arith.constant 0 : index
      %c0_17 = arith.constant 0 : index
      %19 = vector.load %arg5[%c0_15, %c0_16, %c0_17] : memref<1x1x384xf32, #tpu.memory_space<vmem>>, vector<1x1x384xf32>
      tpu.vector_store %arg5[%c0_15, %c0_16, %c0_17], %18 {strides = array<i32>} : memref<1x1x384xf32, #tpu.memory_space<vmem>>, vector<1x1x384xf32>,
    } else {
    }
    return
  }
  func.func @transform_0(%arg0: i32, %arg1: i32) -> (i32, i32) {
    %c0_i32 = arith.constant 0 : i32
    return %arg0, %arg1 : i32, i32
  }
  func.func @transform_1(%arg0: i32, %arg1: i32) -> (i32, i32) {
    %c0_i32 = arith.constant 0 : i32
    return %arg0, %arg1 : i32, i32
  }
  func.func @transform_2(%arg0: i32, %arg1: i32) -> (i32, i32) {
    %c0_i32 = arith.constant 0 : i32
    %c0_i32_0 = arith.constant 0 : i32
    return %arg1, %c0_i32 : i32, i32
  }
  func.func @transform_3(%arg0: i32, %arg1: i32) -> (i32, i32, i32) {
    %c0_i32 = arith.constant 0 : i32
    %c0_i32_0 = arith.constant 0 : i32
    %c0_i32_1 = arith.constant 0 : i32
    return %arg0, %c0_i32, %c0_i32_0 : i32, i32, i32
  }
}

</mosaic_0001>

<bundles_post_ra>
// kernel: tpu_custom_call.1
= control target key start
LH: loop header
LB: loop body
LE: loop exit
PB: predicated region body
PF: predicated region fallthrough
CT: control target
= control target key end

     0   :  { %8 = vsyncpa [#allocation4], 0  ;;  %s863_s0 = inlined_call_operand.hbm [shape: f32[8,256], index: 0, kind: input, shape index: {}]   ;;  %s864_s1 = inlined_call_operand.hbm [shape: f32[8,256], index: 1, kind: input, shape index: {}]   ;;  %s865_s2 = inlined_call_operand.hbm [shape: bf16[256,384], index: 2, kind: input, shape index: {}]   ;;  %s866_s3 = inlined_call_operand.hbm [shape: f32[1,1,384], index: 3, kind: output, shape index: {}]  }
   0x1   :  { %9 = vsyncpa [#allocation7], 0 }
   0x2   :  { %10 = vsyncpa [#allocation5], 0  ;;  %s788_s12 = smov [#allocation6]   ;;  %s789_s14 = smov [#allocation3]  }
   0x3   :  { %s27_s13 = sshll.u32 %s788_s12, 4  ;;  %s17_s15 = sshll.u32 %s789_s14, 4  ;;  %s28_s13 = int_to_ptr.vmem [resolvable:$true] %s27_s13  ;;  %s18_s15 = int_to_ptr.vmem [resolvable:$true] %s17_s15 }
   0x4   :  { %s694_s18 = scalar_lea.hbm %s864_s1, 256 }
   0x5   :  { %p695_p0 = scmp.ne.s32.totalorder %s864_s1, %s694_s18  ;;  %p698_p1 = scmp.lt.u32.totalorder %s694_s18, %s864_s1 }
   0x7   :  { %p700_p2 = pnand %p698_p1, %p695_p0 }
   0x9   :  { %703 = shalt.err (!%p700_p2)
}
   0xa   :  { %s704_s23 = scalar_lea.vmem %s28_s13, 256  ;;  %p709_p4 = scmp.lt.s32.totalorder %s28_s13, %s28_s13 }
   0xb   :  { %p705_p3 = scmp.ne.s32.totalorder %s28_s13, %s704_s23  ;;  %p710_p5 = scmp.lt.s32.totalorder %s704_s23, %s704_s23 }
   0xd   :  { %p711_p6 = por %p710_p5, %p709_p4 }
   0xf   :  { %p712_p7 = pnand %p711_p6, %p705_p3 }
  0x11   :  { %715 = shalt.err (!%p712_p7)
}
  0x12   :  { %30 = dma.hbm_to_vmem [thread:$0]  %s864_s1, 256, %s28_s13, [#allocation7]  }
  0x13   :  { %s716_s28 = scalar_lea.hbm %s863_s0, 256 }
  0x14   :  { %p717_p8 = scmp.ne.s32.totalorder %s863_s0, %s716_s28  ;;  %p720_p9 = scmp.lt.u32.totalorder %s716_s28, %s863_s0 }
  0x16   :  { %p722_p10 = pnand %p720_p9, %p717_p8 }
  0x18   :  { %725 = shalt.err (!%p722_p10)
}
  0x19   :  { %s726_s6 = scalar_lea.vmem %s18_s15, 256  ;;  %p731_p12 = scmp.lt.s32.totalorder %s18_s15, %s18_s15 }
  0x1a   :  { %p727_p11 = scmp.ne.s32.totalorder %s18_s15, %s726_s6  ;;  %p732_p13 = scmp.lt.s32.totalorder %s726_s6, %s726_s6 }
  0x1c   :  { %p733_p0 = por %p732_p13, %p731_p12 }
  0x1e   :  { %p734_p1 = pnand %p733_p0, %p727_p11 }
  0x20   :  { %737 = shalt.err (!%p734_p1)
}
  0x21   :  { %20 = dma.hbm_to_vmem [thread:$0]  %s863_s0, 256, %s18_s15, [#allocation4]  }
  0x22   :  { %s790_s8 = smov [#allocation8]   ;;  %s738_s12 = scalar_lea.hbm %s865_s2, 6144 }
  0x23   :  { %s36_s9 = sshll.u32 %s790_s8, 4  ;;  %p739_p2 = scmp.ne.s32.totalorder %s865_s2, %s738_s12  ;;  %s37_s9 = int_to_ptr.vmem [resolvable:$true] %s36_s9 }
  0x24   :  { %p742_p3 = scmp.lt.u32.totalorder %s738_s12, %s865_s2 }
  0x26   :  { %p744_p4 = pnand %p742_p3, %p739_p2 }
  0x28   :  { %747 = shalt.err (!%p744_p4)
}
  0x29   :  { %s748_s18 = scalar_lea.vmem %s37_s9, 6144  ;;  %p753_p6 = scmp.lt.s32.totalorder %s37_s9, %s37_s9 }
  0x2a   :  { %p749_p5 = scmp.ne.s32.totalorder %s37_s9, %s748_s18  ;;  %p754_p7 = scmp.lt.s32.totalorder %s748_s18, %s748_s18 }
  0x2c   :  { %p755_p8 = por %p754_p7, %p753_p6 }
  0x2e   :  { %p756_p9 = pnand %p755_p8, %p749_p5 }
  0x30   :  { %759 = shalt.err (!%p756_p9)
}
  0x31   :  { %s791_s0 = smov 192   ;;  %s792_s15 = smov 12  }
  0x32   :  { %42 = dma.hbm_to_vmem [thread:$0]  %s865_s2, 6144, %s37_s9, [#allocation7], %s791_s0, %s791_s0, %s792_s15  }
  0x33   :  { %782 = dma.done.wait [#allocation4], 256  }
  0x34   :  { %783 = vsyncadd [#allocation4], 4294967040 }
  0x35   :  { %784 = dma.done.wait [#allocation7], 6400  }
  0x36   :  { %785 = vsyncadd [#allocation7], 4294960896  ;;  %v630_v0 = vld [vmem:[#allocation8 + $0x4] ss:$12 sps:$4 sm:$0xff]   ;;  %v632_v1 = vld [vmem:[#allocation8] ss:$12 sps:$4 sm:$0xff]  }
  0x37   :  { %391 = vmatprep.subr.bf16.mxu0 %v630_v0  ;;  %v633_v2 = vld [vmem:[#allocation8 + $0x1c] ss:$12 sps:$4 sm:$0xff]   ;;  %v635_v3 = vld [vmem:[#allocation8 + $0x18] ss:$12 sps:$4 sm:$0xff]   ;;  %v636_v4 = vld [vmem:[#allocation8 + $0x34] ss:$12 sps:$4 sm:$0xff]  }
  0x38   :  { %392 = vmatpush1.bf16.msra.mxu0 %v632_v1  ;;  %v638_v5 = vld [vmem:[#allocation8 + $0x30] ss:$12 sps:$4 sm:$0xff]   ;;  %v639_v6 = vld [vmem:[#allocation8 + $0x4c] ss:$12 sps:$4 sm:$0xff]   ;;  %v641_v7 = vld [vmem:[#allocation8 + $0x48] ss:$12 sps:$4 sm:$0xff]  }
  0x39   :  { %393 = vmatprep.subr.bf16.mxu0 %v633_v2  ;;  %v651_v8 = vld [vmem:[#allocation8 + $0xc8] ss:$12 sps:$4 sm:$0xff]   ;;  %v642_v10 = vld [vmem:[#allocation8 + $0x64] ss:$12 sps:$4 sm:$0xff]   ;;  %v656_v11 = vld [vmem:[#allocation8 + $0xe0] ss:$12 sps:$4 sm:$0xff]  }
  0x3a   :  { %v652_v9 = vld [vmem:[#allocation8 + $0x8] ss:$12 sps:$4 sm:$0xff]   ;;  %601 = vmatprep.subr.bf16.mxu1 %v651_v8  ;;  %v657_v12 = vld [vmem:[#allocation8 + $0x20] ss:$12 sps:$4 sm:$0xff]   ;;  %v661_v15 = vld [vmem:[#allocation8 + $0xf8] ss:$12 sps:$4 sm:$0xff]  }
  0x3b   :  { %602 = vmatpush3.bf16.msra.mxu1 %v652_v9  ;;  %v644_v13 = vld [vmem:[#allocation8 + $0x60] ss:$12 sps:$4 sm:$0xff]   ;;  %v645_v14 = vld [vmem:[#allocation8 + $0x7c] ss:$12 sps:$4 sm:$0xff]   ;;  %v662_v16 = vld [vmem:[#allocation8 + $0x38] ss:$12 sps:$4 sm:$0xff]  }
  0x3c   :  { %394 = vmatpush1.bf16.msra.mxu0 %v635_v3  ;;  %603 = vmatprep.subr.bf16.mxu1 %v656_v11  ;;  %v647_v17 = vld [vmem:[#allocation8 + $0x78] ss:$12 sps:$4 sm:$0xff]   ;;  %v648_v18 = vld [vmem:[#allocation8 + $0x94] ss:$12 sps:$4 sm:$0xff]   ;;  %v666_v19 = vld [vmem:[#allocation8 + $0x110] ss:$12 sps:$4 sm:$0xff]  }
  0x3d   :  { %395 = vmatprep.subr.bf16.mxu0 %v636_v4  ;;  %v667_v20 = vld [vmem:[#allocation8 + $0x50] ss:$12 sps:$4 sm:$0xff]   ;;  %v671_v22 = vld [vmem:[#allocation8 + $0x128] ss:$12 sps:$4 sm:$0xff]   ;;  %v653_v23 = vld [vmem:[#allocation8 + $0xac] ss:$12 sps:$4 sm:$0xff]  }
  0x3e   :  { %v650_v21 = vld [vmem:[#allocation8 + $0x90] ss:$12 sps:$4 sm:$0xff]   ;;  %v672_v24 = vld [vmem:[#allocation8 + $0x68] ss:$12 sps:$4 sm:$0xff]   ;;  %v676_v25 = vld [vmem:[#allocation8 + $0x140] ss:$12 sps:$4 sm:$0xff]  }
  0x3f   :  { %604 = vmatpush3.bf16.msra.mxu1 %v657_v12  ;;  %v655_v26 = vld [vmem:[#allocation8 + $0xa8] ss:$12 sps:$4 sm:$0xff]   ;;  %v658_v27 = vld [vmem:[#allocation8 + $0xc4] ss:$12 sps:$4 sm:$0xff]   ;;  %v677_v28 = vld [vmem:[#allocation8 + $0x80] ss:$12 sps:$4 sm:$0xff]  }
  0x40   :  { %396 = vmatpush1.bf16.msra.mxu0 %v638_v5  ;;  %605 = vmatprep.subr.bf16.mxu1 %v661_v15  ;;  %v681_v29 = vld [vmem:[#allocation8 + $0x158] ss:$12 sps:$4 sm:$0xff]   ;;  %v660_v30 = vld [vmem:[#allocation8 + $0xc0] ss:$12 sps:$4 sm:$0xff]   ;;  %v663_v31 = vld [vmem:[#allocation8 + $0xdc] ss:$12 sps:$4 sm:$0xff]  }
  0x41   :  { %397 = vmatprep.subr.bf16.mxu0 %v639_v6  ;;  %v665_v32 = vld [vmem:[#allocation8 + $0xd8] ss:$12 sps:$4 sm:$0xff]   ;;  %v686_v34 = vld [vmem:[#allocation8 + $0x170] ss:$12 sps:$4 sm:$0xff]   ;;  %v668_v35 = vld [vmem:[#allocation8 + $0xf4] ss:$12 sps:$4 sm:$0xff]  }
  0x42   :  { %v682_v33 = vld [vmem:[#allocation8 + $0x98] ss:$12 sps:$4 sm:$0xff]   ;;  %v61_v36 = vld [vmem:[#allocation3 + $0x8] sm:$0xff]  ;;  %v687_v37 = vld [vmem:[#allocation8 + $0xb0] ss:$12 sps:$4 sm:$0xff]   ;;  %s794_s2 = smov [#allocation9]  }
  0x43   :  { %606 = vmatpush3.bf16.msra.mxu1 %v662_v16  ;;  %v63_v38 = vld [vmem:[#allocation6 + $0x8] sm:$0xff]  ;;  %v60_v39 = vld [vmem:[#allocation3] sm:$0xff]  ;;  %v62_v41 = vld [vmem:[#allocation6] sm:$0xff]  ;;  %v793_v12 = vmov 1966171168   ;;  %s543_s21 = sshll.u32 %s794_s2, 4  ;;  %s544_s21 = int_to_ptr.vmem [resolvable:$true] %s543_s21 }
  0x44   :  { %398 = vmatpush1.bf16.msra.mxu0 %v641_v7  ;;  %607 = vmatprep.subr.bf16.mxu1 %v666_v19  ;;  %v65_v40 = vsub.f32 %v61_v36, %v63_v38  ;;  %v64_v42 = vsub.f32 %v60_v39, %v62_v41  ;;  %v670_v43 = vld [vmem:[#allocation8 + $0xf0] ss:$12 sps:$4 sm:$0xff]   ;;  %v673_v45 = vld [vmem:[#allocation8 + $0x10c] ss:$12 sps:$4 sm:$0xff]   ;;  %v675_v47 = vld [vmem:[#allocation8 + $0x108] ss:$12 sps:$4 sm:$0xff]   ;;  %p765_p11 = scmp.lt.s32.totalorder %s544_s21, %s544_s21 }
  0x45   :  { %399 = vmatprep.subr.bf16.mxu0 %v642_v10  ;;  %v678_v48 = vld [vmem:[#allocation8 + $0x124] ss:$12 sps:$4 sm:$0xff]   ;;  %v680_v49 = vld [vmem:[#allocation8 + $0x120] ss:$12 sps:$4 sm:$0xff]   ;;  %v683_v50 = vld [vmem:[#allocation8 + $0x13c] ss:$12 sps:$4 sm:$0xff]  }
  0x46   :  { %v67_v44 = vpack.c.bf16 %v65_v40, %v65_v40  ;;  %v66_v46 = vpack.c.bf16 %v64_v42, %v64_v42  ;;  %v685_v51 = vld [vmem:[#allocation8 + $0x138] ss:$12 sps:$4 sm:$0xff]   ;;  %v688_v52 = vld [vmem:[#allocation8 + $0x154] ss:$12 sps:$4 sm:$0xff]   ;;  %v690_v53 = vld [vmem:[#allocation8 + $0x150] ss:$12 sps:$4 sm:$0xff]  }
  0x47   :  { %608 = vmatpush3.bf16.msra.mxu1 %v667_v20  ;;  %v691_v54 = vld [vmem:[#allocation8 + $0x16c] ss:$12 sps:$4 sm:$0xff]   ;;  %v693_v55 = vld [vmem:[#allocation8 + $0x168] ss:$12 sps:$4 sm:$0xff]   ;;  %s760_s22 = scalar_lea.vmem %s544_s21, 48  ;;  %s764_s23 = scalar_lea.vmem %s544_s21, 64 }
  0x48   :  { %400 = vmatpush1.bf16.msra.mxu0 %v644_v13  ;;  %609 = vmatprep.subr.bf16.mxu1 %v671_v22  ;;  %v510_v13 = vunpack.c.l.s4 %v793_v12  ;;  %p761_p10 = scmp.ne.s32.totalorder %s544_s21, %s760_s22  ;;  %p766_p12 = scmp.lt.s32.totalorder %s764_s23, %s760_s22 }
  0x49   :  { %401 = vmatprep.subr.bf16.mxu0 %v645_v14  ;;  %464 = vmatprep.mubr.bf16.mxu1 %v67_v44  ;;  %v512_v14 = vlaneseq }
  0x4a   :  { %423 = vmatprep.mubr.bf16.mxu0 %v67_v44  ;;  %v511_v20 = vunpack.c.0.s8 %v510_v13  ;;  %p767_p13 = por %p766_p12, %p765_p11 }
  0x4b   :  { %610 = vmatpush3.bf16.msra.mxu1 %v672_v24  ;;  %vm534_vm0 = vcmp.lt.s32.totalorder %v512_v14, 384 }
  0x4c   :  { %402 = vmatpush1.bf16.msra.mxu0 %v647_v17  ;;  %611 = vmatprep.subr.bf16.mxu1 %v676_v25  ;;  %p768_p0 = pnand %p767_p13, %p761_p10 }
  0x4d   :  { %403 = vmatprep.subr.bf16.mxu0 %v648_v18 }
  0x4f   :  { %612 = vmatpush3.bf16.msra.mxu1 %v677_v28 }
  0x50   :  { %404 = vmatpush1.bf16.msra.mxu0 %v650_v21  ;;  %613 = vmatprep.subr.bf16.mxu1 %v681_v29  ;;  %v513_v21 = vshrl.u32 %v512_v14, 7 }
  0x51   :  { %405 = vmatprep.subr.bf16.mxu0 %v653_v23 }
  0x53   :  { %614 = vmatpush3.bf16.msra.mxu1 %v682_v33 }
  0x54   :  { %406 = vmatpush1.bf16.msra.mxu0 %v655_v26  ;;  %615 = vmatprep.subr.bf16.mxu1 %v686_v34 }
  0x55   :  { %407 = vmatprep.subr.bf16.mxu0 %v658_v27  ;;  %v514_v27 = vsub.s32 %v511_v20, %v513_v21 }
  0x57   :  { %616 = vmatpush3.bf16.msra.mxu1 %v687_v37 }
  0x58   :  { %408 = vmatpush1.bf16.msra.mxu0 %v660_v30 }
  0x59   :  { %409 = vmatprep.subr.bf16.mxu0 %v663_v31 }
  0x5a   :  { %465 = vmatmul.mubr.bf16.vlgmr.msra.gmra.mrb[0].mxu1 %v66_v46 }
  0x5c   :  { %410 = vmatpush1.bf16.msra.mxu0 %v665_v32 }
  0x5d   :  { %411 = vmatprep.subr.bf16.mxu0 %v668_v35 }
  0x60   :  { %412 = vmatpush1.bf16.msra.mxu0 %v670_v43 }
  0x61   :  { %413 = vmatprep.subr.bf16.mxu0 %v673_v45 }
  0x64   :  { %414 = vmatpush1.bf16.msra.mxu0 %v675_v47 }
  0x65   :  { %415 = vmatprep.subr.bf16.mxu0 %v678_v48 }
  0x68   :  { %416 = vmatpush1.bf16.msra.mxu0 %v680_v49 }
  0x69   :  { %417 = vmatprep.subr.bf16.mxu0 %v683_v50 }
  0x6c   :  { %418 = vmatpush1.bf16.msra.mxu0 %v685_v51 }
  0x6d   :  { %419 = vmatprep.subr.bf16.mxu0 %v688_v52 }
  0x70   :  { %420 = vmatpush1.bf16.msra.mxu0 %v690_v53 }
  0x71   :  { %421 = vmatprep.subr.bf16.mxu0 %v691_v54 }
  0x74   :  { %422 = vmatpush1.bf16.msra.mxu0 %v693_v55 }
  0x77   :  { %424 = vmatmul.mubr.bf16.vlgmr.msra.gmra.mrb[0].mxu0 %v66_v46 }
 0x12d   :  { %v617_v56 = vpop.f32.mrb[0].mxu1 }
 0x12e   :  { %v618_v57 = vpop.f32.mrb[1].mxu1 }
 0x12f   :  { %v619_v58 = vadd.f32 %v618_v57, %v617_v56  ;;  %v620_v59 = vpop.f32.mrb[2].mxu1 }
 0x130   :  { %v621_v60 = vpop.f32.mrb[3].mxu1 }
 0x131   :  { %v486_v61 = vand.u32 2147483647, %v619_v58 }
 0x133   :  { %v499_v62 = vrot.slane %v486_v61, 4 }
 0x135   :  { %v500_v63 = vadd.f32 %v499_v62, %v486_v61 }
 0x137   :  { %v501_v3 = vrot.slane %v500_v63, 2 }
 0x139   :  { %v502_v10 = vadd.f32 %v501_v3, %v500_v63 }
 0x13b   :  { %v503_v18 = vrot.slane %v502_v10, 1 }
 0x13d   :  { %v504_v25 = vadd.f32 %v503_v18, %v502_v10 }
 0x13f   :  { %v522_v30 = vrot.slane %v504_v25, %v514_v27 }
 0x14a   :  { %v425_v0 = vpop.f32.mrb[0].mxu0 }
 0x14b   :  { %v484_v1 = vand.u32 2147483647, %v425_v0  ;;  %v427_v2 = vpop.f32.mrb[1].mxu0 }
 0x14c   :  { %v485_v4 = vand.u32 2147483647, %v427_v2  ;;  %v429_v5 = vpop.f32.mrb[2].mxu0 }
 0x14d   :  { %v487_v6 = vrot.slane %v484_v1, 4  ;;  %v430_v7 = vpop.f32.mrb[3].mxu0 }
 0x14e   :  { %v493_v8 = vrot.slane %v485_v4, 4 }
 0x14f   :  { %v488_v9 = vadd.f32 %v487_v6, %v484_v1 }
 0x150   :  { %v494_v11 = vadd.f32 %v493_v8, %v485_v4 }
 0x151   :  { %v489_v15 = vrot.slane %v488_v9, 2 }
 0x152   :  { %v495_v16 = vrot.slane %v494_v11, 2 }
 0x153   :  { %v490_v17 = vadd.f32 %v489_v15, %v488_v9 }
 0x154   :  { %v496_v19 = vadd.f32 %v495_v16, %v494_v11 }
 0x155   :  { %v491_v22 = vrot.slane %v490_v17, 1 }
 0x156   :  { %v497_v23 = vrot.slane %v496_v19, 1 }
 0x157   :  { %v492_v24 = vadd.f32 %v491_v22, %v490_v17 }
 0x158   :  { %v498_v26 = vadd.f32 %v497_v23, %v496_v19 }
 0x15a   :  { %v508_v28 = vcombine.low %v492_v24, %v498_v26 }
 0x15c   :  { %v515_v29 = vrot.slane %v508_v28, %v514_v27 }
 0x15e   :  { %v523_v31 = vcombine.low %v515_v29, %v522_v30 }
 0x160   :  { %v530_v32 = vrot.slane %v523_v31, %v514_v27 }
 0x162   :  { %536 = vst.msk [vmem:[#allocation9] sm:$0x7] %vm534_vm0, %v530_v32 }
 0x163   :  { %771 = shalt.err (!%p768_p0)
}
 0x164   :  { %s772_s26 = scalar_lea.hbm %s866_s3, 48 }
 0x165   :  { %p773_p1 = scmp.ne.s32.totalorder %s866_s3, %s772_s26  ;;  %p776_p2 = scmp.lt.u32.totalorder %s772_s26, %s866_s3 }
 0x167   :  { %p778_p3 = pnand %p776_p2, %p773_p1 }
 0x169   :  { %781 = shalt.err (!%p778_p3)
}
 0x16a   :  { %546 = dma.vmem_to_hbm [thread:$0]  %s544_s21, 48, %s866_s3, [#allocation5]  }
 0x16b   :  { %786 = dma.done.wait [#allocation5], 48  }
 0x16c   :  { %787 = vsyncadd [#allocation5], 4294967248 }
 0x16d   :  { %550 = vsyncpa [#allocation4], 1 }
 0x16e   :  { %551 = vsyncpa [#allocation7], 1 }
 0x16f   :  { %552 = vsyncpa [#allocation5], 1 }

// kernel: tpu_custom_call.1
= control target key start
LH: loop header
LB: loop body
LE: loop exit
PB: predicated region body
PF: predicated region fallthrough
CT: control target
= control target key end

     0   :  { %8 = vsyncpa [#allocation4], 0  ;;  %s863_s0 = inlined_call_operand.hbm [shape: f32[8,256], index: 0, kind: input, shape index: {}]   ;;  %s864_s1 = inlined_call_operand.hbm [shape: f32[8,256], index: 1, kind: input, shape index: {}]   ;;  %s865_s2 = inlined_call_operand.hbm [shape: bf16[256,384], index: 2, kind: input, shape index: {}]   ;;  %s866_s3 = inlined_call_operand.hbm [shape: f32[1,1,384], index: 3, kind: output, shape index: {}]  }
   0x1   :  { %9 = vsyncpa [#allocation7], 0 }
   0x2   :  { %10 = vsyncpa [#allocation5], 0  ;;  %s788_s12 = smov [#allocation6]   ;;  %s789_s14 = smov [#allocation3]  }
   0x3   :  { %s27_s13 = sshll.u32 %s788_s12, 4  ;;  %s17_s15 = sshll.u32 %s789_s14, 4  ;;  %s28_s13 = int_to_ptr.vmem [resolvable:$true] %s27_s13  ;;  %s18_s15 = int_to_ptr.vmem [resolvable:$true] %s17_s15 }
   0x4   :  { %s694_s18 = scalar_lea.hbm %s864_s1, 256 }
   0x5   :  { %p695_p0 = scmp.ne.s32.totalorder %s864_s1, %s694_s18  ;;  %p698_p1 = scmp.lt.u32.totalorder %s694_s18, %s864_s1 }
   0x7   :  { %p700_p2 = pnand %p698_p1, %p695_p0 }
   0x9   :  { %703 = shalt.err (!%p700_p2)
}
   0xa   :  { %s704_s23 = scalar_lea.vmem %s28_s13, 256  ;;  %p709_p4 = scmp.lt.s32.totalorder %s28_s13, %s28_s13 }
   0xb   :  { %p705_p3 = scmp.ne.s32.totalorder %s28_s13, %s704_s23  ;;  %p710_p5 = scmp.lt.s32.totalorder %s704_s23, %s704_s23 }
   0xd   :  { %p711_p6 = por %p710_p5, %p709_p4 }
   0xf   :  { %p712_p7 = pnand %p711_p6, %p705_p3 }
  0x11   :  { %715 = shalt.err (!%p712_p7)
}
  0x12   :  { %30 = dma.hbm_to_vmem [thread:$0]  %s864_s1, 256, %s28_s13, [#allocation7]  }
  0x13   :  { %s716_s28 = scalar_lea.hbm %s863_s0, 256 }
  0x14   :  { %p717_p8 = scmp.ne.s32.totalorder %s863_s0, %s716_s28  ;;  %p720_p9 = scmp.lt.u32.totalorder %s716_s28, %s863_s0 }
  0x16   :  { %p722_p10 = pnand %p720_p9, %p717_p8 }
  0x18   :  { %725 = shalt.err (!%p722_p10)
}
  0x19   :  { %s726_s6 = scalar_lea.vmem %s18_s15, 256  ;;  %p731_p12 = scmp.lt.s32.totalorder %s18_s15, %s18_s15 }
  0x1a   :  { %p727_p11 = scmp.ne.s32.totalorder %s18_s15, %s726_s6  ;;  %p732_p13 = scmp.lt.s32.totalorder %s726_s6, %s726_s6 }
  0x1c   :  { %p733_p0 = por %p732_p13, %p731_p12 }
  0x1e   :  { %p734_p1 = pnand %p733_p0, %p727_p11 }
  0x20   :  { %737 = shalt.err (!%p734_p1)
}
  0x21   :  { %20 = dma.hbm_to_vmem [thread:$0]  %s863_s0, 256, %s18_s15, [#allocation4]  }
  0x22   :  { %s790_s8 = smov [#allocation8]   ;;  %s738_s12 = scalar_lea.hbm %s865_s2, 6144 }
  0x23   :  { %s36_s9 = sshll.u32 %s790_s8, 4  ;;  %p739_p2 = scmp.ne.s32.totalorder %s865_s2, %s738_s12  ;;  %s37_s9 = int_to_ptr.vmem [resolvable:$true] %s36_s9 }
  0x24   :  { %p742_p3 = scmp.lt.u32.totalorder %s738_s12, %s865_s2 }
  0x26   :  { %p744_p4 = pnand %p742_p3, %p739_p2 }
  0x28   :  { %747 = shalt.err (!%p744_p4)
}
  0x29   :  { %s748_s18 = scalar_lea.vmem %s37_s9, 6144  ;;  %p753_p6 = scmp.lt.s32.totalorder %s37_s9, %s37_s9 }
  0x2a   :  { %p749_p5 = scmp.ne.s32.totalorder %s37_s9, %s748_s18  ;;  %p754_p7 = scmp.lt.s32.totalorder %s748_s18, %s748_s18 }
  0x2c   :  { %p755_p8 = por %p754_p7, %p753_p6 }
  0x2e   :  { %p756_p9 = pnand %p755_p8, %p749_p5 }
  0x30   :  { %759 = shalt.err (!%p756_p9)
}
  0x31   :  { %s791_s0 = smov 192   ;;  %s792_s15 = smov 12  }
  0x32   :  { %42 = dma.hbm_to_vmem [thread:$0]  %s865_s2, 6144, %s37_s9, [#allocation7], %s791_s0, %s791_s0, %s792_s15  }
  0x33   :  { %782 = dma.done.wait [#allocation4], 256  }
  0x34   :  { %783 = vsyncadd [#allocation4], 4294967040 }
  0x35   :  { %784 = dma.done.wait [#allocation7], 6400  }
  0x36   :  { %785 = vsyncadd [#allocation7], 4294960896  ;;  %v630_v0 = vld [vmem:[#allocation8 + $0x4] ss:$12 sps:$4 sm:$0xff]   ;;  %v632_v1 = vld [vmem:[#allocation8] ss:$12 sps:$4 sm:$0xff]  }
  0x37   :  { %391 = vmatprep.subr.bf16.mxu0 %v630_v0  ;;  %v633_v2 = vld [vmem:[#allocation8 + $0x1c] ss:$12 sps:$4 sm:$0xff]   ;;  %v635_v3 = vld [vmem:[#allocation8 + $0x18] ss:$12 sps:$4 sm:$0xff]   ;;  %v636_v4 = vld [vmem:[#allocation8 + $0x34] ss:$12 sps:$4 sm:$0xff]  }
  0x38   :  { %392 = vmatpush1.bf16.msra.mxu0 %v632_v1  ;;  %v638_v5 = vld [vmem:[#allocation8 + $0x30] ss:$12 sps:$4 sm:$0xff]   ;;  %v639_v6 = vld [vmem:[#allocation8 + $0x4c] ss:$12 sps:$4 sm:$0xff]   ;;  %v641_v7 = vld [vmem:[#allocation8 + $0x48] ss:$12 sps:$4 sm:$0xff]  }
  0x39   :  { %393 = vmatprep.subr.bf16.mxu0 %v633_v2  ;;  %v651_v8 = vld [vmem:[#allocation8 + $0xc8] ss:$12 sps:$4 sm:$0xff]   ;;  %v642_v10 = vld [vmem:[#allocation8 + $0x64] ss:$12 sps:$4 sm:$0xff]   ;;  %v656_v11 = vld [vmem:[#allocation8 + $0xe0] ss:$12 sps:$4 sm:$0xff]  }
  0x3a   :  { %v652_v9 = vld [vmem:[#allocation8 + $0x8] ss:$12 sps:$4 sm:$0xff]   ;;  %601 = vmatprep.subr.bf16.mxu1 %v651_v8  ;;  %v657_v12 = vld [vmem:[#allocation8 + $0x20] ss:$12 sps:$4 sm:$0xff]   ;;  %v661_v15 = vld [vmem:[#allocation8 + $0xf8] ss:$12 sps:$4 sm:$0xff]  }
  0x3b   :  { %602 = vmatpush3.bf16.msra.mxu1 %v652_v9  ;;  %v644_v13 = vld [vmem:[#allocation8 + $0x60] ss:$12 sps:$4 sm:$0xff]   ;;  %v645_v14 = vld [vmem:[#allocation8 + $0x7c] ss:$12 sps:$4 sm:$0xff]   ;;  %v662_v16 = vld [vmem:[#allocation8 + $0x38] ss:$12 sps:$4 sm:$0xff]  }
  0x3c   :  { %394 = vmatpush1.bf16.msra.mxu0 %v635_v3  ;;  %603 = vmatprep.subr.bf16.mxu1 %v656_v11  ;;  %v647_v17 = vld [vmem:[#allocation8 + $0x78] ss:$12 sps:$4 sm:$0xff]   ;;  %v648_v18 = vld [vmem:[#allocation8 + $0x94] ss:$12 sps:$4 sm:$0xff]   ;;  %v666_v19 = vld [vmem:[#allocation8 + $0x110] ss:$12 sps:$4 sm:$0xff]  }
  0x3d   :  { %395 = vmatprep.subr.bf16.mxu0 %v636_v4  ;;  %v667_v20 = vld [vmem:[#allocation8 + $0x50] ss:$12 sps:$4 sm:$0xff]   ;;  %v671_v22 = vld [vmem:[#allocation8 + $0x128] ss:$12 sps:$4 sm:$0xff]   ;;  %v653_v23 = vld [vmem:[#allocation8 + $0xac] ss:$12 sps:$4 sm:$0xff]  }
  0x3e   :  { %v650_v21 = vld [vmem:[#allocation8 + $0x90] ss:$12 sps:$4 sm:$0xff]   ;;  %v672_v24 = vld [vmem:[#allocation8 + $0x68] ss:$12 sps:$4 sm:$0xff]   ;;  %v676_v25 = vld [vmem:[#allocation8 + $0x140] ss:$12 sps:$4 sm:$0xff]  }
  0x3f   :  { %604 = vmatpush3.bf16.msra.mxu1 %v657_v12  ;;  %v655_v26 = vld [vmem:[#allocation8 + $0xa8] ss:$12 sps:$4 sm:$0xff]   ;;  %v658_v27 = vld [vmem:[#allocation8 + $0xc4] ss:$12 sps:$4 sm:$0xff]   ;;  %v677_v28 = vld [vmem:[#allocation8 + $0x80] ss:$12 sps:$4 sm:$0xff]  }
  0x40   :  { %396 = vmatpush1.bf16.msra.mxu0 %v638_v5  ;;  %605 = vmatprep.subr.bf16.mxu1 %v661_v15  ;;  %v681_v29 = vld [vmem:[#allocation8 + $0x158] ss:$12 sps:$4 sm:$0xff]   ;;  %v660_v30 = vld [vmem:[#allocation8 + $0xc0] ss:$12 sps:$4 sm:$0xff]   ;;  %v663_v31 = vld [vmem:[#allocation8 + $0xdc] ss:$12 sps:$4 sm:$0xff]  }
  0x41   :  { %397 = vmatprep.subr.bf16.mxu0 %v639_v6  ;;  %v665_v32 = vld [vmem:[#allocation8 + $0xd8] ss:$12 sps:$4 sm:$0xff]   ;;  %v686_v34 = vld [vmem:[#allocation8 + $0x170] ss:$12 sps:$4 sm:$0xff]   ;;  %v668_v35 = vld [vmem:[#allocation8 + $0xf4] ss:$12 sps:$4 sm:$0xff]  }
  0x42   :  { %v682_v33 = vld [vmem:[#allocation8 + $0x98] ss:$12 sps:$4 sm:$0xff]   ;;  %v61_v36 = vld [vmem:[#allocation3 + $0x8] sm:$0xff]  ;;  %v687_v37 = vld [vmem:[#allocation8 + $0xb0] ss:$12 sps:$4 sm:$0xff]   ;;  %s794_s2 = smov [#allocation9]  }
  0x43   :  { %606 = vmatpush3.bf16.msra.mxu1 %v662_v16  ;;  %v63_v38 = vld [vmem:[#allocation6 + $0x8] sm:$0xff]  ;;  %v60_v39 = vld [vmem:[#allocation3] sm:$0xff]  ;;  %v62_v41 = vld [vmem:[#allocation6] sm:$0xff]  ;;  %v793_v12 = vmov 1966171168   ;;  %s543_s21 = sshll.u32 %s794_s2, 4  ;;  %s544_s21 = int_to_ptr.vmem [resolvable:$true] %s543_s21 }
  0x44   :  { %398 = vmatpush1.bf16.msra.mxu0 %v641_v7  ;;  %607 = vmatprep.subr.bf16.mxu1 %v666_v19  ;;  %v65_v40 = vsub.f32 %v61_v36, %v63_v38  ;;  %v64_v42 = vsub.f32 %v60_v39, %v62_v41  ;;  %v670_v43 = vld [vmem:[#allocation8 + $0xf0] ss:$12 sps:$4 sm:$0xff]   ;;  %v673_v45 = vld [vmem:[#allocation8 + $0x10c] ss:$12 sps:$4 sm:$0xff]   ;;  %v675_v47 = vld [vmem:[#allocation8 + $0x108] ss:$12 sps:$4 sm:$0xff]   ;;  %p765_p11 = scmp.lt.s32.totalorder %s544_s21, %s544_s21 }
  0x45   :  { %399 = vmatprep.subr.bf16.mxu0 %v642_v10  ;;  %v678_v48 = vld [vmem:[#allocation8 + $0x124] ss:$12 sps:$4 sm:$0xff]   ;;  %v680_v49 = vld [vmem:[#allocation8 + $0x120] ss:$12 sps:$4 sm:$0xff]   ;;  %v683_v50 = vld [vmem:[#allocation8 + $0x13c] ss:$12 sps:$4 sm:$0xff]  }
  0x46   :  { %v67_v44 = vpack.c.bf16 %v65_v40, %v65_v40  ;;  %v66_v46 = vpack.c.bf16 %v64_v42, %v64_v42  ;;  %v685_v51 = vld [vmem:[#allocation8 + $0x138] ss:$12 sps:$4 sm:$0xff]   ;;  %v688_v52 = vld [vmem:[#allocation8 + $0x154] ss:$12 sps:$4 sm:$0xff]   ;;  %v690_v53 = vld [vmem:[#allocation8 + $0x150] ss:$12 sps:$4 sm:$0xff]  }
  0x47   :  { %608 = vmatpush3.bf16.msra.mxu1 %v667_v20  ;;  %v691_v54 = vld [vmem:[#allocation8 + $0x16c] ss:$12 sps:$4 sm:$0xff]   ;;  %v693_v55 = vld [vmem:[#allocation8 + $0x168] ss:$12 sps:$4 sm:$0xff]   ;;  %s760_s22 = scalar_lea.vmem %s544_s21, 48  ;;  %s764_s23 = scalar_lea.vmem %s544_s21, 64 }
  0x48   :  { %400 = vmatpush1.bf16.msra.mxu0 %v644_v13  ;;  %609 = vmatprep.subr.bf16.mxu1 %v671_v22  ;;  %v510_v13 = vunpack.c.l.s4 %v793_v12  ;;  %p761_p10 = scmp.ne.s32.totalorder %s544_s21, %s760_s22  ;;  %p766_p12 = scmp.lt.s32.totalorder %s764_s23, %s760_s22 }
  0x49   :  { %401 = vmatprep.subr.bf16.mxu0 %v645_v14  ;;  %464 = vmatprep.mubr.bf16.mxu1 %v67_v44  ;;  %v512_v14 = vlaneseq }
  0x4a   :  { %423 = vmatprep.mubr.bf16.mxu0 %v67_v44  ;;  %v511_v20 = vunpack.c.0.s8 %v510_v13  ;;  %p767_p13 = por %p766_p12, %p765_p11 }
  0x4b   :  { %610 = vmatpush3.bf16.msra.mxu1 %v672_v24  ;;  %vm534_vm0 = vcmp.lt.s32.totalorder %v512_v14, 384 }
  0x4c   :  { %402 = vmatpush1.bf16.msra.mxu0 %v647_v17  ;;  %611 = vmatprep.subr.bf16.mxu1 %v676_v25  ;;  %p768_p0 = pnand %p767_p13, %p761_p10 }
  0x4d   :  { %403 = vmatprep.subr.bf16.mxu0 %v648_v18 }
  0x4f   :  { %612 = vmatpush3.bf16.msra.mxu1 %v677_v28 }
  0x50   :  { %404 = vmatpush1.bf16.msra.mxu0 %v650_v21  ;;  %613 = vmatprep.subr.bf16.mxu1 %v681_v29  ;;  %v513_v21 = vshrl.u32 %v512_v14, 7 }
  0x51   :  { %405 = vmatprep.subr.bf16.mxu0 %v653_v23 }
  0x53   :  { %614 = vmatpush3.bf16.msra.mxu1 %v682_v33 }
  0x54   :  { %406 = vmatpush1.bf16.msra.mxu0 %v655_v26  ;;  %615 = vmatprep.subr.bf16.mxu1 %v686_v34 }
  0x55   :  { %407 = vmatprep.subr.bf16.mxu0 %v658_v27  ;;  %v514_v27 = vsub.s32 %v511_v20, %v513_v21 }
  0x57   :  { %616 = vmatpush3.bf16.msra.mxu1 %v687_v37 }
  0x58   :  { %408 = vmatpush1.bf16.msra.mxu0 %v660_v30 }
  0x59   :  { %409 = vmatprep.subr.bf16.mxu0 %v663_v31 }
  0x5a   :  { %465 = vmatmul.mubr.bf16.vlgmr.msra.gmra.mrb[0].mxu1 %v66_v46 }
  0x5c   :  { %410 = vmatpush1.bf16.msra.mxu0 %v665_v32 }
  0x5d   :  { %411 = vmatprep.subr.bf16.mxu0 %v668_v35 }
  0x60   :  { %412 = vmatpush1.bf16.msra.mxu0 %v670_v43 }
  0x61   :  { %413 = vmatprep.subr.bf16.mxu0 %v673_v45 }
  0x64   :  { %414 = vmatpush1.bf16.msra.mxu0 %v675_v47 }
  0x65   :  { %415 = vmatprep.subr.bf16.mxu0 %v678_v48 }
  0x68   :  { %416 = vmatpush1.bf16.msra.mxu0 %v680_v49 }
  0x69   :  { %417 = vmatprep.subr.bf16.mxu0 %v683_v50 }
  0x6c   :  { %418 = vmatpush1.bf16.msra.mxu0 %v685_v51 }
  0x6d   :  { %419 = vmatprep.subr.bf16.mxu0 %v688_v52 }
  0x70   :  { %420 = vmatpush1.bf16.msra.mxu0 %v690_v53 }
  0x71   :  { %421 = vmatprep.subr.bf16.mxu0 %v691_v54 }
  0x74   :  { %422 = vmatpush1.bf16.msra.mxu0 %v693_v55 }
  0x77   :  { %424 = vmatmul.mubr.bf16.vlgmr.msra.gmra.mrb[0].mxu0 %v66_v46 }
 0x12d   :  { %v617_v56 = vpop.f32.mrb[0].mxu1 }
 0x12e   :  { %v618_v57 = vpop.f32.mrb[1].mxu1 }
 0x12f   :  { %v619_v58 = vadd.f32 %v618_v57, %v617_v56  ;;  %v620_v59 = vpop.f32.mrb[2].mxu1 }
 0x130   :  { %v621_v60 = vpop.f32.mrb[3].mxu1 }
 0x131   :  { %v486_v61 = vand.u32 2147483647, %v619_v58 }
 0x133   :  { %v499_v62 = vrot.slane %v486_v61, 4 }
 0x135   :  { %v500_v63 = vadd.f32 %v499_v62, %v486_v61 }
 0x137   :  { %v501_v3 = vrot.slane %v500_v63, 2 }
 0x139   :  { %v502_v10 = vadd.f32 %v501_v3, %v500_v63 }
 0x13b   :  { %v503_v18 = vrot.slane %v502_v10, 1 }
 0x13d   :  { %v504_v25 = vadd.f32 %v503_v18, %v502_v10 }
 0x13f   :  { %v522_v30 = vrot.slane %v504_v25, %v514_v27 }
 0x14a   :  { %v425_v0 = vpop.f32.mrb[0].mxu0 }
 0x14b   :  { %v484_v1 = vand.u32 2147483647, %v425_v0  ;;  %v427_v2 = vpop.f32.mrb[1].mxu0 }
 0x14c   :  { %v485_v4 = vand.u32 2147483647, %v427_v2  ;;  %v429_v5 = vpop.f32.mrb[2].mxu0 }
 0x14d   :  { %v487_v6 = vrot.slane %v484_v1, 4  ;;  %v430_v7 = vpop.f32.mrb[3].mxu0 }
 0x14e   :  { %v493_v8 = vrot.slane %v485_v4, 4 }
 0x14f   :  { %v488_v9 = vadd.f32 %v487_v6, %v484_v1 }
 0x150   :  { %v494_v11 = vadd.f32 %v493_v8, %v485_v4 }
 0x151   :  { %v489_v15 = vrot.slane %v488_v9, 2 }
 0x152   :  { %v495_v16 = vrot.slane %v494_v11, 2 }
 0x153   :  { %v490_v17 = vadd.f32 %v489_v15, %v488_v9 }
 0x154   :  { %v496_v19 = vadd.f32 %v495_v16, %v494_v11 }
 0x155   :  { %v491_v22 = vrot.slane %v490_v17, 1 }
 0x156   :  { %v497_v23 = vrot.slane %v496_v19, 1 }
 0x157   :  { %v492_v24 = vadd.f32 %v491_v22, %v490_v17 }
 0x158   :  { %v498_v26 = vadd.f32 %v497_v23, %v496_v19 }
 0x15a   :  { %v508_v28 = vcombine.low %v492_v24, %v498_v26 }
 0x15c   :  { %v515_v29 = vrot.slane %v508_v28, %v514_v27 }
 0x15e   :  { %v523_v31 = vcombine.low %v515_v29, %v522_v30 }
 0x160   :  { %v530_v32 = vrot.slane %v523_v31, %v514_v27 }
 0x162   :  { %536 = vst.msk [vmem:[#allocation9] sm:$0x7] %vm534_vm0, %v530_v32 }
 0x163   :  { %771 = shalt.err (!%p768_p0)
}
 0x164   :  { %s772_s26 = scalar_lea.hbm %s866_s3, 48 }
 0x165   :  { %p773_p1 = scmp.ne.s32.totalorder %s866_s3, %s772_s26  ;;  %p776_p2 = scmp.lt.u32.totalorder %s772_s26, %s866_s3 }
 0x167   :  { %p778_p3 = pnand %p776_p2, %p773_p1 }
 0x169   :  { %781 = shalt.err (!%p778_p3)
}
 0x16a   :  { %546 = dma.vmem_to_hbm [thread:$0]  %s544_s21, 48, %s866_s3, [#allocation5]  }
 0x16b   :  { %786 = dma.done.wait [#allocation5], 48  }
 0x16c   :  { %787 = vsyncadd [#allocation5], 4294967248 }
 0x16d   :  { %550 = vsyncpa [#allocation4], 1 }
 0x16e   :  { %551 = vsyncpa [#allocation7], 1 }
 0x16f   :  { %552 = vsyncpa [#allocation5], 1 }

</bundles_post_ra>
